<compile_context>
chip_gen: v6e
topology: v6e:2x2x1
jax: 0.10.0
libtpu: 0.0.40
codegen_flags: <defaults>
</compile_context>

<pallas_src>
from collections import defaultdict

import jax
import jax.numpy as jnp
from jax.experimental import pallas as pl
from jax.experimental.pallas import tpu as pltpu


# ----------------------------------------------------------------------------
# Dict path: one pallas_call per (shape, dtype) group, each key a separate ref.
# ----------------------------------------------------------------------------
def _make_grouped_kernel(W, K):
    def kernel(w_ref, *refs):
        # w_ref: SMEM (W,) scalars.
        # refs[:K]: K VMEM refs of shape (W, block_d); refs[K]: VMEM out (K, block_d).
        e_refs, o_ref = refs[:K], refs[K]
        rows = []
        for e_ref in e_refs:
            acc = w_ref[0] * e_ref[0:1, :].astype(jnp.float32)
            for wi in range(1, W):
                acc = acc + w_ref[wi] * e_ref[wi:wi + 1, :].astype(jnp.float32)
            rows.append(acc)                               # (1, block_d) each
        tile = rows[0] if K == 1 else jnp.concatenate(rows, axis=0)  # (K, block_d)
        o_ref[...] = tile.astype(o_ref.dtype)
    return kernel


def _pick_block_d(D, max_block_d):
    if D <= max_block_d:
        return D                                            # full dim: one lane-dense tile
    return max(128, (max_block_d // 128) * 128)             # guard: multiple of 128


def weighted_prompt_forward(weight, graph_embedding, *, max_block_d=16384):
    """weight: (1, W); graph_embedding: dict[str, (W, D)] -> dict[str, (1, D)]."""
    w_flat = weight.reshape(-1).astype(jnp.float32)
    W = w_flat.shape[0]

    # Group keys by (shape, dtype) so each group is fused into one pallas_call
    # with zero wrapper-side copies (no stack, no pad).
    groups = defaultdict(list)
    for k, v in graph_embedding.items():
        assert v.ndim == 2 and v.shape[0] == W, (
            f"embedding '{k}' must have shape (weightednum={W}, D); got {v.shape}")
        groups[(v.shape, jnp.dtype(v.dtype))].append(k)

    out = {}
    for (shape, dtype), keys in groups.items():
        D = shape[1]
        K = len(keys)
        block_d = _pick_block_d(D, max_block_d)
        grid_d = pl.cdiv(D, block_d)                        # Pallas masks the tail tile

        res = pl.pallas_call(
            _make_grouped_kernel(W, K),
            out_shape=jax.ShapeDtypeStruct((K, D), dtype),
            grid=(grid_d,),
            in_specs=[pl.BlockSpec(memory_space=pltpu.MemorySpace.SMEM)]
                     + [pl.BlockSpec((W, block_d), lambda j: (0, j))] * K,
            out_specs=pl.BlockSpec((K, block_d), lambda j: (0, j)),
            compiler_params=pltpu.CompilerParams(
                dimension_semantics=("parallel",)),
        )(w_flat, *[graph_embedding[k] for k in keys])

        for i, k in enumerate(keys):
            out[k] = res[i:i + 1]                           # (1, D), matches torch.mm
    return out


# ----------------------------------------------------------------------------
# Stacked fast path: caller keeps embeddings persistently as (W, K, D).
# Dense (BLOCK_K, block_d) tiles, unmasked stores, fewest grid steps.
# ----------------------------------------------------------------------------
def _make_stacked_kernel(W):
    def kernel(w_ref, e_ref, o_ref):
        # e_ref: VMEM (W, BLOCK_K, block_d); o_ref: VMEM (BLOCK_K, block_d)
        acc = w_ref[0] * e_ref[0].astype(jnp.float32)
        for wi in range(1, W):
            acc = acc + w_ref[wi] * e_ref[wi].astype(jnp.float32)
        o_ref[...] = acc.astype(o_ref.dtype)
    return kernel


def weighted_prompt_forward_stacked(weight, emb_wkd, *, block_k=None, max_block_d=16384):
    """weight: (1, W); emb_wkd: (W, K, D) -> (K, D) = weight @ emb per key."""
    W, K, D = emb_wkd.shape
    w_flat = weight.reshape(-1).astype(jnp.float32)

    if block_k is None:
        block_k = 16 if emb_wkd.dtype == jnp.bfloat16 else 8   # full sublane occupancy
    block_k = min(block_k, K)
    block_d = _pick_block_d(D, max_block_d)

    return pl.pallas_call(
        _make_stacked_kernel(W),
        out_shape=jax.ShapeDtypeStruct((K, D), emb_wkd.dtype),
        grid=(pl.cdiv(K, block_k), pl.cdiv(D, block_d)),
        in_specs=[
            pl.BlockSpec(memory_space=pltpu.MemorySpace.SMEM),
            pl.BlockSpec((W, block_k, block_d), lambda i, j: (0, i, j)),
        ],
        out_specs=pl.BlockSpec((block_k, block_d), lambda i, j: (i, j)),
        compiler_params=pltpu.CompilerParams(
            dimension_semantics=("parallel", "parallel")),
    )(w_flat, emb_wkd)


if __name__ == "__main__":
    weightednum = 2
    D = 256  # hidden size of each prompt embedding

    # Deterministic parameter init matching reset_parameters():
    #   weight[0,0] = 0.1, weight[0,1] = 1.0
    weight = jnp.array([[0.1, 1.0]], dtype=jnp.float32)

    key = jax.random.PRNGKey(0)
    k1, k2, k3, k4 = jax.random.split(key, 4)
    graph_embedding = {
        "drug": jax.random.normal(k1, (weightednum, D), dtype=jnp.float32),
        "disease": jax.random.normal(k2, (weightednum, D), dtype=jnp.float32),
        "gene": jax.random.normal(k3, (weightednum, D), dtype=jnp.float32),
    }

    ok = True

    # Dict interface (matches the PyTorch forward).
    out = weighted_prompt_forward(weight, graph_embedding)
    out = jax.tree_util.tree_map(jax.block_until_ready, out)
    for kname, emb in graph_embedding.items():
        ref = weight @ emb
        if out[kname].shape != (1, D) or not jnp.allclose(out[kname], ref, atol=1e-5, rtol=1e-5):
            ok = False

    # Stacked (W, K, D) fast path with blocked-K dense tiles.
    K = 16
    emb_wkd = jax.random.normal(k4, (weightednum, K, D), dtype=jnp.float32)
    res = jax.block_until_ready(weighted_prompt_forward_stacked(weight, emb_wkd))
    ref_stacked = jnp.einsum("w,wkd->kd", weight.reshape(-1), emb_wkd)
    if res.shape != (K, D) or not jnp.allclose(res, ref_stacked, atol=1e-5, rtol=1e-5):
        ok = False

    # TODO(synk): self.act (nn.ELU) is declared in the module but never applied in
    # forward, so it is intentionally omitted here as well.
    print("KERNEL_OK" if ok else "KERNEL_MISMATCH")
</pallas_src>

<mosaic_0001>
module attributes {stable_mosaic.version = 11 : i64} {
  func.func @kernel(%arg0: i32, %arg1: memref<2xf32, #tpu.memory_space<smem>>, %arg2: memref<2x256xf32, #tpu.memory_space<vmem>>, %arg3: memref<2x256xf32, #tpu.memory_space<vmem>>, %arg4: memref<2x256xf32, #tpu.memory_space<vmem>>, %arg5: memref<3x256xf32, #tpu.memory_space<vmem>>) attributes {dimension_semantics = [#tpu.dimension_semantics<parallel>], iteration_bounds = array<i64: 1>, scalar_prefetch = 0 : i64, scratch_operands = 0 : i64, tpu.core_type = #tpu.core_type<tc>, window_params = [{transform_indices = @transform_0, window_bounds = array<i64: 2>}, {transform_indices = @transform_1, window_bounds = array<i64: 2, 256>}, {transform_indices = @transform_2, window_bounds = array<i64: 2, 256>}, {transform_indices = @transform_3, window_bounds = array<i64: 2, 256>}, {transform_indices = @transform_4, window_bounds = array<i64: 3, 256>}]} {
    %c0 = arith.constant 0 : index
    %0 = memref.load %arg1[%c0] : memref<2xf32, #tpu.memory_space<smem>>
    %c0_0 = arith.constant 0 : index
    %c0_1 = arith.constant 0 : index
    %1 = vector.load %arg2[%c0_0, %c0_1] : memref<2x256xf32, #tpu.memory_space<vmem>>, vector<1x256xf32>
    %2 = vector.broadcast %0 : f32 to vector<1x256xf32>
    %3 = arith.mulf %2, %1 : vector<1x256xf32>
    %c1 = arith.constant 1 : index
    %4 = memref.load %arg1[%c1] : memref<2xf32, #tpu.memory_space<smem>>
    %c1_2 = arith.constant 1 : index
    %c0_3 = arith.constant 0 : index
    %5 = vector.load %arg2[%c1_2, %c0_3] : memref<2x256xf32, #tpu.memory_space<vmem>>, vector<1x256xf32>
    %6 = vector.broadcast %4 : f32 to vector<1x256xf32>
    %7 = arith.mulf %6, %5 : vector<1x256xf32>
    %8 = arith.addf %3, %7 : vector<1x256xf32>
    %c0_4 = arith.constant 0 : index
    %9 = memref.load %arg1[%c0_4] : memref<2xf32, #tpu.memory_space<smem>>
    %c0_5 = arith.constant 0 : index
    %c0_6 = arith.constant 0 : index
    %10 = vector.load %arg3[%c0_5, %c0_6] : memref<2x256xf32, #tpu.memory_space<vmem>>, vector<1x256xf32>
    %11 = vector.broadcast %9 : f32 to vector<1x256xf32>
    %12 = arith.mulf %11, %10 : vector<1x256xf32>
    %c1_7 = arith.constant 1 : index
    %13 = memref.load %arg1[%c1_7] : memref<2xf32, #tpu.memory_space<smem>>
    %c1_8 = arith.constant 1 : index
    %c0_9 = arith.constant 0 : index
    %14 = vector.load %arg3[%c1_8, %c0_9] : memref<2x256xf32, #tpu.memory_space<vmem>>, vector<1x256xf32>
    %15 = vector.broadcast %13 : f32 to vector<1x256xf32>
    %16 = arith.mulf %15, %14 : vector<1x256xf32>
    %17 = arith.addf %12, %16 : vector<1x256xf32>
    %c0_10 = arith.constant 0 : index
    %18 = memref.load %arg1[%c0_10] : memref<2xf32, #tpu.memory_space<smem>>
    %c0_11 = arith.constant 0 : index
    %c0_12 = arith.constant 0 : index
    %19 = vector.load %arg4[%c0_11, %c0_12] : memref<2x256xf32, #tpu.memory_space<vmem>>, vector<1x256xf32>
    %20 = vector.broadcast %18 : f32 to vector<1x256xf32>
    %21 = arith.mulf %20, %19 : vector<1x256xf32>
    %c1_13 = arith.constant 1 : index
    %22 = memref.load %arg1[%c1_13] : memref<2xf32, #tpu.memory_space<smem>>
    %c1_14 = arith.constant 1 : index
    %c0_15 = arith.constant 0 : index
    %23 = vector.load %arg4[%c1_14, %c0_15] : memref<2x256xf32, #tpu.memory_space<vmem>>, vector<1x256xf32>
    %24 = vector.broadcast %22 : f32 to vector<1x256xf32>
    %25 = arith.mulf %24, %23 : vector<1x256xf32>
    %26 = arith.addf %21, %25 : vector<1x256xf32>
    %27 = tpu.concatenate %8, %17, %26 in 0 : vector<1x256xf32>, vector<1x256xf32>, vector<1x256xf32> -> vector<3x256xf32>
    %c0_16 = arith.constant 0 : index
    %c0_17 = arith.constant 0 : index
    %28 = vector.load %arg5[%c0_16, %c0_17] : memref<3x256xf32, #tpu.memory_space<vmem>>, vector<3x256xf32>
    tpu.vector_store %arg5[%c0_16, %c0_17], %27 {strides = array<i32>} : memref<3x256xf32, #tpu.memory_space<vmem>>, vector<3x256xf32>,
    return
  }
  func.func @transform_0(%arg0: i32) -> i32 {
    %c0_i32 = arith.constant 0 : i32
    %c0_i32_0 = arith.constant 0 : i32
    return %c0_i32 : i32
  }
  func.func @transform_1(%arg0: i32) -> (i32, i32) {
    %c0_i32 = arith.constant 0 : i32
    %c0_i32_0 = arith.constant 0 : i32
    return %c0_i32, %arg0 : i32, i32
  }
  func.func @transform_2(%arg0: i32) -> (i32, i32) {
    %c0_i32 = arith.constant 0 : i32
    %c0_i32_0 = arith.constant 0 : i32
    return %c0_i32, %arg0 : i32, i32
  }
  func.func @transform_3(%arg0: i32) -> (i32, i32) {
    %c0_i32 = arith.constant 0 : i32
    %c0_i32_0 = arith.constant 0 : i32
    return %c0_i32, %arg0 : i32, i32
  }
  func.func @transform_4(%arg0: i32) -> (i32, i32) {
    %c0_i32 = arith.constant 0 : i32
    %c0_i32_0 = arith.constant 0 : i32
    return %c0_i32, %arg0 : i32, i32
  }
}

</mosaic_0001>

<bundles_post_ra>
// kernel: tpu_custom_call.1
= control target key start
LH: loop header
LB: loop body
LE: loop exit
PB: predicated region body
PF: predicated region fallthrough
CT: control target
= control target key end

     0   :  { %9 = vsyncpa [#allocation5], 0  ;;  %s265_s0 = inlined_call_operand.hbm [shape: f32[2], index: 0, kind: input, shape index: {}]   ;;  %s266_s1 = inlined_call_operand.hbm [shape: f32[2,256], index: 1, kind: input, shape index: {}]   ;;  %s267_s2 = inlined_call_operand.hbm [shape: f32[2,256], index: 2, kind: input, shape index: {}]   ;;  %s268_s3 = inlined_call_operand.vmem [shape: f32[2,256], index: 3, kind: input, shape index: {}]   ;;  %s269_s4 = inlined_call_operand.hbm [shape: f32[3,256], index: 4, kind: output, shape index: {}]  }
   0x1   :  { %10 = vsyncpa [#allocation3], 0 }
   0x2   :  { %11 = vsyncpa [#allocation8], 0 }
   0x3   :  { %12 = vsyncpa [#allocation4], 0  ;;  %s218_s15 = smov [#allocation2]   ;;  %s219_s18 = smov [#allocation6]  }
   0x4   :  { %20 = dma.hbm_to_smem %s265_s0, 16, %s218_s15, [#allocation5]  }
   0x5   :  { %s27_s19 = sshll.u32 %s219_s18, 4  ;;  %s220_s20 = smov [#allocation7]   ;;  %s28_s19 = int_to_ptr.vmem [resolvable:$true] %s27_s19 }
   0x6   :  { %s37_s21 = sshll.u32 %s220_s20, 4  ;;  %s158_s22 = scalar_lea.vmem %s28_s19, 64  ;;  %s38_s21 = int_to_ptr.vmem [resolvable:$true] %s37_s21 }
   0x7   :  { %p159_p0 = scmp.ne.s32.totalorder %s28_s19, %s158_s22  ;;  %p163_p1 = scmp.lt.s32.totalorder %s28_s19, %s28_s19 }
   0x8   :  { %p164_p2 = scmp.lt.s32.totalorder %s158_s22, %s158_s22 }
   0xa   :  { %p165_p3 = por %p164_p2, %p163_p1 }
   0xc   :  { %p166_p4 = pnand %p165_p3, %p159_p0 }
   0xe   :  { %169 = shalt.err (!%p166_p4)
}
   0xf   :  { %30 = dma.hbm_to_vmem [thread:$0]  %s266_s1, 64, %s28_s19, [#allocation3]  }
  0x10   :  { %s178_s25 = scalar_lea.vmem %s38_s21, 64  ;;  %p183_p6 = scmp.lt.s32.totalorder %s38_s21, %s38_s21 }
  0x11   :  { %p179_p5 = scmp.ne.s32.totalorder %s38_s21, %s178_s25  ;;  %p184_p7 = scmp.lt.s32.totalorder %s178_s25, %s178_s25 }
  0x13   :  { %p185_p8 = por %p184_p7, %p183_p6 }
  0x15   :  { %p186_p9 = pnand %p185_p8, %p179_p5 }
  0x17   :  { %189 = shalt.err (!%p186_p9)
}
  0x18   :  { %40 = dma.hbm_to_vmem [thread:$0]  %s267_s2, 64, %s38_s21, [#allocation8]  }
  0x19   :  { %210 = dma.done.wait [#allocation5], 16  }
  0x1a   :  { %211 = vsyncadd [#allocation5], 4294967280 }
  0x1b   :  { %212 = dma.done.wait [#allocation3], 64  }
  0x1c   :  { %213 = vsyncadd [#allocation3], 4294967232 }
  0x1d   :  { %214 = dma.done.wait [#allocation8], 64  }
  0x1e   :  { %215 = vsyncadd [#allocation8], 4294967232 }
  0x1f   :  { %52 = sfence }
  0x20   :  { %s53_s1 = sld [smem:[#allocation2]]  ;;  %v76_v0 = vlaneseq  ;;  %v54_v1 = vld [vmem:[#allocation6] ss:$2 sm:$0x3]  ;;  %vm108_vm0 = vcmask 1040384   ;;  %vm111_vm1 = vcmask 1041408  }
  0x21   :  { %s136_s27 = sld [smem:[#allocation2 + $0x1]]  ;;  %v59_v2 = vld [vmem:[#allocation6 + $0x1] ss:$2 sm:$0x3] }
  0x22   :  { %v63_v3 = vld [vmem:[#allocation7] ss:$2 sm:$0x3]  ;;  %v69_v4 = vld [vmem:[%s268_s3] ss:$2 sm:$0x3] }
  0x23   :  { %v77_v5 = vshrl.u32 %v76_v0, 7  ;;  %v66_v6 = vld [vmem:[#allocation7 + $0x1] ss:$2 sm:$0x3] }
  0x24   :  { %v137_v7 = vld [vmem:[%s268_s3 + $0x1] ss:$2 sm:$0x3]  ;;  %s221_s3 = smov [#allocation9]  }
  0x25   :  { %v78_v9 = vsub.s32 0, %v77_v5  ;;  %v82_v17 = vsub.s32 1, %v77_v5  ;;  %s125_s5 = sshll.u32 %s221_s3, 4  ;;  %s126_s5 = int_to_ptr.vmem [resolvable:$true] %s125_s5 }
  0x26   :  { %v55_v8 = vstv %s53_s1  ;;  %s190_s6 = scalar_lea.vmem %s126_s5, 128  ;;  %p195_p11 = scmp.lt.s32.totalorder %s126_s5, %s126_s5 }
  0x27   :  { %v56_v10 = vmul.f32 %v55_v8, %v54_v1  ;;  %v60_v11 = vstv %s136_s27  ;;  %v64_v12 = vmul.f32 %v63_v3, %v55_v8  ;;  %v70_v13 = vmul.f32 %v69_v4, %v55_v8  ;;  %p191_p10 = scmp.ne.s32.totalorder %s126_s5, %s190_s6  ;;  %p196_p12 = scmp.lt.s32.totalorder %s190_s6, %s190_s6 }
  0x28   :  { %v61_v14 = vmul.f32 %v60_v11, %v59_v2  ;;  %v67_v15 = vmul.f32 %v66_v6, %v60_v11  ;;  %v73_v16 = vmul.f32 %v137_v7, %v60_v11 }
  0x29   :  { %p197_p13 = por %p196_p12, %p195_p11 }
  0x2a   :  { %v62_v18 = vadd.f32 %v61_v14, %v56_v10  ;;  %v68_v19 = vadd.f32 %v67_v15, %v64_v12  ;;  %v74_v20 = vadd.f32 %v73_v16, %v70_v13 }
  0x2b   :  { %p198_p0 = pnand %p197_p13, %p191_p10 }
  0x2c   :  { %v79_v21 = vrot.slane %v62_v18, %v78_v9  ;;  %v83_v22 = vrot.slane %v62_v18, %v82_v17  ;;  %v90_v23 = vrot.slane %v68_v19, %v78_v9  ;;  %v94_v24 = vrot.slane %v68_v19, %v82_v17 }
  0x2d   :  { %v101_v25 = vrot.slane %v74_v20, %v78_v9  ;;  %v105_v26 = vrot.slane %v74_v20, %v82_v17 }
  0x2e   :  { %v109_v27 = vsel %vm108_vm0, %v79_v21, %v90_v23  ;;  %v110_v28 = vsel %vm108_vm0, %v83_v22, %v94_v24 }
  0x2f   :  { %v112_v29 = vsel %vm111_vm1, %v109_v27, %v101_v25  ;;  %v113_v30 = vsel %vm111_vm1, %v110_v28, %v105_v26 }
  0x30   :  { %v116_v31 = vcombine.low %v112_v29, %v113_v30 }
  0x32   :  { %118 = vst [vmem:[#allocation9] sm:$0x77] %v116_v31 }
  0x33   :  { %201 = shalt.err (!%p198_p0)
}
  0x34   :  { %128 = dma.vmem_to_hbm [thread:$0]  %s126_s5, 128, %s269_s4, [#allocation4]  }
  0x35   :  { %216 = dma.done.wait [#allocation4], 128  }
  0x36   :  { %217 = vsyncadd [#allocation4], 4294967168 }
  0x37   :  { %132 = vsyncpa [#allocation3], 1 }
  0x38   :  { %133 = vsyncpa [#allocation8], 1 }
  0x39   :  { %134 = vsyncpa [#allocation4], 1 }
  0x3a   :  { %135 = vsyncpa [#allocation5], 1 }

</bundles_post_ra>
